<compile_context>
chip_gen: v7x
topology: tpu7x:2x2x1
jax: 0.10.0
libtpu: 0.0.40
codegen_flags: <defaults>
</compile_context>

<pallas_src>
import math

import jax
import jax.numpy as jnp
from jax.experimental import pallas as pl
from jax.experimental.pallas import tpu as pltpu


def _copy_kernel(x_ref, o_ref):
    # Pure copy: the "squeeze" is a free reshape done in the wrapper, so both
    # refs are dense 2-D tiles (no degenerate size-1 trailing dims).
    o_ref[...] = x_ref[...]


def _vmem_budget_bytes():
    """Generation-aware VMEM budget + explicit scoped limit."""
    try:
        cap = int(pltpu.get_tpu_info().vmem_capacity_bytes)
    except Exception:  # conservative fallback: assume a 64 MiB part (v7x)
        cap = 64 * 1024 * 1024
    # 64 MiB limit on 128 MiB parts (v5e/v6e), 32 MiB on v7x's 64 MiB VMEM.
    limit = min(cap // 2, 64 * 1024 * 1024)
    budget = (limit * 3) // 4  # headroom for pipeline bookkeeping
    return budget, limit


def _pick_2d_view(B, C):
    """Pick a lane-dense (rows, cols) view of the contiguous (B, C) data."""
    N = B * C
    if C % 128 == 0 or N % 128 != 0:
        return B, C  # already lane-dense, or cannot be flattened losslessly
    cols = 128
    while cols * 2 <= 8192 and N % (cols * 2) == 0:
        cols *= 2
    return N // cols, cols


def squeeze_last_two(x):
    """Pallas equivalent of SqueezeLastTwo.forward: (B, C, 1, 1) -> (B, C)."""
    B, C = x.shape[0], x.shape[1]
    assert math.prod(x.shape[2:]) == 1, (
        "SqueezeLastTwo requires trailing dims to multiply to 1 "
        f"(got shape {x.shape})"
    )

    dtype = x.dtype
    itemsize = jnp.dtype(dtype).itemsize

    # Metadata-only reshape (row-major contiguous) done OUTSIDE the kernel.
    rows, cols = _pick_2d_view(B, C)
    x2 = x.reshape(rows, cols)

    vmem_budget, vmem_limit = _vmem_budget_bytes()

    # Sublane multiple follows dtype packing (8 for 32-bit, 16 bf16, 32 int8).
    sub = max(8, 32 // itemsize)
    # VMEM rows are padded to 128 lanes; size tiles with the PADDED width.
    padded_cols = pl.cdiv(cols, 128) * 128
    per_buffer = vmem_budget // 4  # 2 input + 2 output double buffers

    if 4 * sub * padded_cols * itemsize > vmem_budget:
        # Huge-C guard: tile the lane dim too (multiples of 128), minimal rows.
        tr = sub
        tc = max(128, (per_buffer // (sub * itemsize * 128)) * 128)
        tc = min(tc, padded_cols)
    else:
        tc = cols  # full-extent lane dim (always a legal block shape)
        max_tr = per_buffer // (padded_cols * itemsize)
        tr = max(sub, (max_tr // sub) * sub)
        tr = min(tr, pl.cdiv(rows, sub) * sub)
        if rows <= tr:
            tr = rows  # full-extent block is always legal

    grid = (pl.cdiv(rows, tr), pl.cdiv(cols, tc))

    out2 = pl.pallas_call(
        _copy_kernel,
        out_shape=jax.ShapeDtypeStruct((rows, cols), dtype),
        grid=grid,
        in_specs=[pl.BlockSpec((tr, tc), lambda i, j: (i, j))],
        out_specs=pl.BlockSpec((tr, tc), lambda i, j: (i, j)),
        input_output_aliases={0: 0},  # let XLA do the copy in place
        cost_estimate=pl.CostEstimate(
            flops=0,
            transcendentals=0,
            bytes_accessed=2 * rows * cols * itemsize,
        ),
        compiler_params=pltpu.CompilerParams(
            dimension_semantics=("parallel", "parallel"),
            vmem_limit_bytes=vmem_limit,
        ),
    )(x2)

    return out2.reshape(B, C)


if __name__ == "__main__":
    key = jax.random.PRNGKey(0)

    # Shape implied by the module: a (B, C, 1, 1) pooled conv output.
    B, C = 2, 4
    x = jax.random.normal(key, (B, C, 1, 1), dtype=jnp.float32)
    ref = x.reshape(B, C)  # reference computed before the (aliased) call

    out = jax.block_until_ready(squeeze_last_two(x))
    assert out.shape == (B, C), f"bad shape {out.shape}"
    assert out.dtype == x.dtype, f"bad dtype {out.dtype}"
    assert bool(jnp.array_equal(out, ref)), "kernel output mismatch vs reference"

    # Exercise the lane-dense flatten path + bf16 sublane packing (B*C % 128 == 0).
    B2, C2 = 16, 64
    x2 = jax.random.normal(jax.random.PRNGKey(1), (B2, C2, 1, 1), dtype=jnp.bfloat16)
    ref2 = x2.reshape(B2, C2)
    out2 = jax.block_until_ready(squeeze_last_two(x2))
    assert out2.shape == (B2, C2), f"bad shape {out2.shape}"
    assert bool(jnp.array_equal(out2, ref2)), "bf16 path mismatch vs reference"

    print("KERNEL_OK")
</pallas_src>

<mosaic_0001>
module attributes {stable_mosaic.version = 11 : i64} {
  func.func @_copy_kernel(%arg0: i32, %arg1: i32, %arg2: memref<2x4xf32, #tpu.memory_space<vmem>>, %arg3: memref<2x4xf32, #tpu.memory_space<vmem>>) attributes {dimension_semantics = [#tpu.dimension_semantics<parallel>, #tpu.dimension_semantics<parallel>], iteration_bounds = array<i64: 1, 1>, scalar_prefetch = 0 : i64, scratch_operands = 0 : i64, tpu.core_type = #tpu.core_type<tc>, window_params = [{transform_indices = @transform_0, window_bounds = array<i64: 2, 4>}, {transform_indices = @transform_1, window_bounds = array<i64: 2, 4>}]} {
    %c0 = arith.constant 0 : index
    %c0_0 = arith.constant 0 : index
    %0 = vector.load %arg2[%c0, %c0_0] : memref<2x4xf32, #tpu.memory_space<vmem>>, vector<2x4xf32>
    %c0_1 = arith.constant 0 : index
    %c0_2 = arith.constant 0 : index
    %1 = vector.load %arg3[%c0_1, %c0_2] : memref<2x4xf32, #tpu.memory_space<vmem>>, vector<2x4xf32>
    tpu.vector_store %arg3[%c0_1, %c0_2], %0 {strides = array<i32>} : memref<2x4xf32, #tpu.memory_space<vmem>>, vector<2x4xf32>,
    return
  }
  func.func @transform_0(%arg0: i32, %arg1: i32) -> (i32, i32) {
    %c0_i32 = arith.constant 0 : i32
    return %arg0, %arg1 : i32, i32
  }
  func.func @transform_1(%arg0: i32, %arg1: i32) -> (i32, i32) {
    %c0_i32 = arith.constant 0 : i32
    return %arg0, %arg1 : i32, i32
  }
}

</mosaic_0001>

<bundles_post_ra>
// kernel: tpu_custom_call.1
= control target key start
LH: loop header
LB: loop body
LE: loop exit
PB: predicated region body
PF: predicated region fallthrough
CT: control target
= control target key end

     0   :  { %6 = vsyncpa [#allocation3], 0  ;;  %s125_s0 = inlined_call_operand.hbm [shape: f32[2,4], index: 0, kind: input, shape index: {}, may-alias: {0,1}]   ;;  %s126_s1 = inlined_call_operand.hbm [shape: f32[2,4], index: 1, kind: output, shape index: {}, may-alias: {0,1}]  }
   0x1   :  { %7 = vsyncpa [#allocation4], 0  ;;  %s89_s6 = smov [#allocation2]   ;;  %s41_s10 = scalar_lea.hbm %s125_s0, 32 }
   0x2   :  { %s14_s7 = sshll.u32 %s89_s6, 4  ;;  %p42_p0 = scmp.ne.s32.totalorder %s125_s0, %s41_s10  ;;  %s15_s7 = int_to_ptr.vmem [resolvable:$true] %s14_s7 }
   0x3   :  { %p45_p1 = scmp.lt.u32.totalorder %s41_s10, %s125_s0 }
   0x5   :  { %p47_p2 = pnand %p45_p1, %p42_p0 }
   0x7   :  { %50 = shalt.err (!%p47_p2)
}
   0x8   :  { %s51_s15 = scalar_lea.vmem %s15_s7, 32  ;;  %p56_p4 = scmp.lt.s32.totalorder %s15_s7, %s15_s7 }
   0x9   :  { %p52_p3 = scmp.ne.s32.totalorder %s15_s7, %s51_s15  ;;  %p57_p5 = scmp.lt.s32.totalorder %s51_s15, %s51_s15 }
   0xb   :  { %p58_p6 = por %p57_p5, %p56_p4 }
   0xd   :  { %p59_p7 = pnand %p58_p6, %p52_p3 }
   0xf   :  { %62 = shalt.err (!%p59_p7)
}
  0x10   :  { %17 = dma.hbm_to_vmem [thread:$0]  %s125_s0, 32, %s15_s7, [#allocation3]  }
  0x11   :  { %85 = dma.done.wait [#allocation3], 32  }
  0x12   :  { %86 = vsyncadd [#allocation3], 4294967264  ;;  %s90_s18 = smov [#allocation5]   ;;  %vm22_vm0 = vcmask 25600   ;;  %v21_v0 = vld [vmem:[#allocation2] sm:$0x3] }
  0x13   :  { %s30_s19 = sshll.u32 %s90_s18, 4  ;;  %23 = vst.msk [vmem:[#allocation5] sm:$0x3] %vm22_vm0, %v21_v0  ;;  %s31_s19 = int_to_ptr.vmem [resolvable:$true] %s30_s19 }
  0x14   :  { %s63_s20 = scalar_lea.vmem %s31_s19, 32  ;;  %p68_p9 = scmp.lt.s32.totalorder %s31_s19, %s31_s19 }
  0x15   :  { %p64_p8 = scmp.ne.s32.totalorder %s31_s19, %s63_s20  ;;  %p69_p10 = scmp.lt.s32.totalorder %s63_s20, %s63_s20 }
  0x17   :  { %p70_p11 = por %p69_p10, %p68_p9 }
  0x19   :  { %p71_p12 = pnand %p70_p11, %p64_p8 }
  0x1b   :  { %74 = shalt.err (!%p71_p12)
}
  0x1c   :  { %s75_s23 = scalar_lea.hbm %s126_s1, 32 }
  0x1d   :  { %p76_p13 = scmp.ne.s32.totalorder %s126_s1, %s75_s23  ;;  %p79_p0 = scmp.lt.u32.totalorder %s75_s23, %s126_s1 }
  0x1f   :  { %p81_p1 = pnand %p79_p0, %p76_p13 }
  0x21   :  { %84 = shalt.err (!%p81_p1)
}
  0x22   :  { %33 = dma.vmem_to_hbm [thread:$0]  %s31_s19, 32, %s126_s1, [#allocation4]  }
  0x23   :  { %87 = dma.done.wait [#allocation4], 32  }
  0x24   :  { %88 = vsyncadd [#allocation4], 4294967264 }
  0x25   :  { %37 = vsyncpa [#allocation3], 1 }
  0x26   :  { %38 = vsyncpa [#allocation4], 1 }

</bundles_post_ra>
